<compile_context>
chip_gen: v7x
topology: tpu7x:2x2x1
jax: 0.10.0
libtpu: 0.0.40
codegen_flags: <defaults>
</compile_context>

<pallas_src>
import math

import jax
import jax.numpy as jnp
from jax.experimental import pallas as pl
from jax.experimental.pallas import tpu as pltpu


def _make_loss_css_kernel(TR, TL, ACC_ROWS):
    """Kernel factory; block is a (TR, TL) slab of the (N*C, L_pad) views."""

    def kernel(out_ref, lab_ref, nothead_ref, rrmse_ref, grad_ref, acc_r, acc_g):
        j = pl.program_id(1)

        # (Re)initialise the accumulators at the start of each lane-axis sweep
        # (the lane axis is the reduction axis for this row tile).
        @pl.when(j == 0)
        def _():
            acc_r[...] = jnp.zeros_like(acc_r)
            acc_g[...] = jnp.zeros_like(acc_g)

        o = out_ref[...].astype(jnp.float32)
        l = lab_ref[...].astype(jnp.float32)
        nothead = nothead_ref[...]          # (TR, 1) f32; 1.0 where row % C != 0

        # Fused formulation around d = o - l:
        #   rrmse term : |d| / l
        #   grad  term : |d - d_prev * nothead|
        #                (= |d| on channel-head rows, |d - d_prev| elsewhere)
        d = o - l
        ad = jnp.abs(d)

        # EUP approximate reciprocal + one Newton-Raphson refinement: moves the
        # divide off the VALU slot; the ~1e-4 HW error is squared to ~1e-8,
        # well inside the 1e-5 validation tolerance.
        r = pl.reciprocal(l, approx=True)
        r = r * (2.0 - l * r)
        err = ad * r

        # Previous-row values via a sublane rotate (XLU slot, otherwise idle).
        # Head rows (row % C == 0) zero out d_prev via the hoisted column; the
        # wraparound row is always a head row because TR is a multiple of C.
        d_prev = pltpu.roll(d, shift=1, axis=0)
        gterm = jnp.abs(d - d_prev * nothead)

        # Fold row groups together with elementwise VPU adds (layout-preserving
        # leading-dim split); keep the (ACC_ROWS, TL) slab resident so the
        # expensive cross-lane reduce runs only once per row tile.
        # TODO(synk): if bundle dumps still show the VALU slot saturating on
        # v7x, swap this fold for an MXU dot against a constant 0/1 selection
        # matrix (idle vector-extended slot) after validating f32 precision.
        acc_r[...] += err.reshape(TR // ACC_ROWS, ACC_ROWS, TL).sum(axis=0)
        acc_g[...] += gterm.reshape(TR // ACC_ROWS, ACC_ROWS, TL).sum(axis=0)

        # Finalise: one cross-lane reduce, emit this row tile's partial sums.
        @pl.when(j == pl.num_programs(1) - 1)
        def _():
            rrmse_ref[0, 0] = jnp.sum(acc_r[...])
            grad_ref[0, 0] = jnp.sum(acc_g[...])

    return kernel


def _pick_tile(total, quantum, cap, prefer_split=False):
    """Largest multiple of `quantum` that divides `total` and is <= cap.
    With prefer_split=True, prefer sizes that give >= 2 (ideally an even
    number of) tiles so the parallel axis feeds both v7x TensorCores.
    Falls back to the full extent (always a legal block size)."""
    candidates = []
    t = quantum
    while t <= min(total, cap):
        if total % t == 0:
            candidates.append(t)
        t += quantum
    if not candidates:
        return total
    if prefer_split:
        even_split = [t for t in candidates
                      if total // t >= 2 and (total // t) % 2 == 0]
        any_split = [t for t in candidates if total // t >= 2]
        if even_split:
            return max(even_split)
        if any_split:
            return max(any_split)
    return max(candidates)


def loss_train_css(outputs, label, *, max_row_tile=256, max_lane_tile=4096):
    """Pallas implementation of LossTrainCSS.forward. Returns (rrmse, grad_loss)."""
    N, C, H, W = outputs.shape
    R, L = N * C, H * W
    n_total = float(N * C * H * W)

    # Dense 2-D layout: channel axis on sublanes, spatial axis on lanes.
    o2 = outputs.reshape(R, L)
    l2 = label.reshape(R, L)

    # Pad the lane axis up to a multiple of 128 so tiles stay lane-dense and
    # bounded.  Padded elements use outputs == label == 1, so they contribute
    # exactly 0 to both sums (d = 0 -> err = 0, gterm = 0).
    L_pad = ((L + 127) // 128) * 128
    if L_pad != L:
        o2 = jnp.pad(o2, ((0, 0), (0, L_pad - L)), constant_values=1.0)
        l2 = jnp.pad(l2, ((0, 0), (0, L_pad - L)), constant_values=1.0)

    # Hoisted head-row mask: 1.0 where row % C != 0 (channel-gradient rows),
    # 0.0 on channel-head rows -> no per-element iota/mod/select in the kernel.
    rows = jnp.arange(R, dtype=jnp.int32)
    nothead = ((rows % C) != 0).astype(jnp.float32).reshape(R, 1)

    # Row tile: multiple of lcm(C, sublane quantum) so the channel diff is
    # halo-free and sublanes stay packed (quantum 16 for bf16 inputs).
    # Lane tile: large multiple of 128 for a lane-dense, pipelined reduction.
    sub_q = {4: 8, 2: 16, 1: 32}.get(jnp.dtype(outputs.dtype).itemsize, 8)
    TR = _pick_tile(R, math.lcm(C, sub_q), max_row_tile, prefer_split=True)
    TL = _pick_tile(L_pad, 128, max_lane_tile)
    ACC_ROWS = 8 if TR % 8 == 0 else TR

    grid = (R // TR, L_pad // TL)
    kernel = _make_loss_css_kernel(TR, TL, ACC_ROWS)

    rrmse_parts, grad_parts = pl.pallas_call(
        kernel,
        out_shape=(
            jax.ShapeDtypeStruct((grid[0], 1), jnp.float32),
            jax.ShapeDtypeStruct((grid[0], 1), jnp.float32),
        ),
        grid_spec=pltpu.PrefetchScalarGridSpec(
            num_scalar_prefetch=0,
            grid=grid,
            in_specs=[
                pl.BlockSpec((TR, TL), lambda i, j: (i, j)),
                pl.BlockSpec((TR, TL), lambda i, j: (i, j)),
                pl.BlockSpec((TR, 1), lambda i, j: (i, 0)),
            ],
            out_specs=(
                pl.BlockSpec((1, 1), lambda i, j: (i, 0),
                             memory_space=pltpu.MemorySpace.SMEM),
                pl.BlockSpec((1, 1), lambda i, j: (i, 0),
                             memory_space=pltpu.MemorySpace.SMEM),
            ),
            scratch_shapes=[
                pltpu.VMEM((ACC_ROWS, TL), jnp.float32),
                pltpu.VMEM((ACC_ROWS, TL), jnp.float32),
            ],
        ),
        compiler_params=pltpu.CompilerParams(
            # Row tiles are independent (own output + own accumulator reset),
            # so they can be sharded across TensorCores on v7x; the lane axis
            # is the streaming reduction axis.
            dimension_semantics=("parallel", "arbitrary"),
            # Larger lane-dense tiles need more than the scoped-VMEM default;
            # 48 MiB fits every generation (v7x: 64 MiB phys, v5e/v6e: 128 MiB).
            vmem_limit_bytes=48 * 1024 * 1024,
        ),
    )(o2, l2, nothead)

    # Tiny cross-tile reduction + normalisation in plain XLA.
    rrmse = jnp.sum(rrmse_parts) / n_total
    grad_loss = jnp.sum(grad_parts) / n_total
    return rrmse, grad_loss


def _reference(outputs, label):
    """Pure-JAX reference matching the PyTorch module."""
    error = jnp.abs(outputs - label) / label
    rrmse = jnp.mean(error)
    go = jnp.concatenate(
        [outputs[:, 0:1], outputs[:, 1:] - outputs[:, :-1]], axis=1)
    gl = jnp.concatenate(
        [label[:, 0:1], label[:, 1:] - label[:, :-1]], axis=1)
    grad_loss = jnp.mean(jnp.abs(go - gl))
    return rrmse, grad_loss


def _check(shape, key, **tile_kwargs):
    k1, k2 = jax.random.split(key)
    # label must be nonzero (it is a divisor); keep it strictly positive.
    label = jax.random.uniform(k1, shape, jnp.float32, minval=0.5, maxval=1.5)
    outputs = label + 0.1 * jax.random.normal(k2, shape, jnp.float32)

    rrmse, grad_loss = loss_train_css(outputs, label, **tile_kwargs)
    jax.block_until_ready((rrmse, grad_loss))

    ref_rrmse, ref_grad = _reference(outputs, label)
    assert jnp.allclose(rrmse, ref_rrmse, rtol=1e-5, atol=1e-6), (
        shape, rrmse, ref_rrmse)
    assert jnp.allclose(grad_loss, ref_grad, rtol=1e-5, atol=1e-6), (
        shape, grad_loss, ref_grad)


if __name__ == "__main__":
    key = jax.random.PRNGKey(0)
    k1, k2, k3, k4, k5 = jax.random.split(key, 5)

    # Base shape from the module spec: single-tile grid.
    _check((2, 4, 16, 16), k1)
    # Two row tiles (parallel axis for v7x), single lane tile.
    _check((2, 8, 32, 128), k2)
    # Multi-tile along the lane (reduction) axis: accumulate/finalize path.
    _check((2, 8, 32, 128), k3, max_lane_tile=1024)
    # 2x2 grid on a small tensor: parallel row axis + per-row-tile accumulator
    # reset / SMEM partial outputs.
    _check((4, 4, 16, 16), k4, max_row_tile=8, max_lane_tile=128)
    # H*W not a multiple of 128: exercises the lane-padding path.
    _check((2, 4, 10, 10), k5)

    print("KERNEL_OK")
</pallas_src>

<mosaic_0001>
module attributes {stable_mosaic.version = 11 : i64} {
  func.func @kernel(%arg0: i32, %arg1: i32, %arg2: memref<8x256xf32, #tpu.memory_space<vmem>>, %arg3: memref<8x256xf32, #tpu.memory_space<vmem>>, %arg4: memref<8x1xf32, #tpu.memory_space<vmem>>, %arg5: memref<1x1xf32, #tpu.memory_space<smem>>, %arg6: memref<1x1xf32, #tpu.memory_space<smem>>, %arg7: memref<8x256xf32, #tpu.memory_space<vmem>>, %arg8: memref<8x256xf32, #tpu.memory_space<vmem>>) attributes {dimension_semantics = [#tpu.dimension_semantics<parallel>, #tpu.dimension_semantics<arbitrary>], iteration_bounds = array<i64: 1, 1>, scalar_prefetch = 0 : i64, scratch_operands = 2 : i64, tpu.core_type = #tpu.core_type<tc>, window_params = [{transform_indices = @transform_0, window_bounds = array<i64: 8, 256>}, {transform_indices = @transform_1, window_bounds = array<i64: 8, 256>}, {transform_indices = @transform_2, window_bounds = array<i64: 8, 1>}, {transform_indices = @transform_3, window_bounds = array<i64: 1, 1>}, {transform_indices = @transform_4, window_bounds = array<i64: 1, 1>}]} {
    %c0_i32 = arith.constant 0 : i32
    %0 = arith.cmpi eq, %arg1, %c0_i32 : i32
    %1 = arith.extui %0 : i1 to i32
    %c0_i32_0 = arith.constant 0 : i32
    %2 = arith.cmpi ne, %1, %c0_i32_0 : i32
    scf.if %2 {
      %cst_18 = arith.constant 0.000000e+00 : f32
      %32 = vector.broadcast %cst_18 : f32 to vector<8x256xf32>
      %c0_19 = arith.constant 0 : index
      %c0_20 = arith.constant 0 : index
      %33 = vector.load %arg7[%c0_19, %c0_20] : memref<8x256xf32, #tpu.memory_space<vmem>>, vector<8x256xf32>
      tpu.vector_store %arg7[%c0_19, %c0_20], %32 {strides = array<i32>} : memref<8x256xf32, #tpu.memory_space<vmem>>, vector<8x256xf32>,
      %cst_21 = arith.constant 0.000000e+00 : f32
      %34 = vector.broadcast %cst_21 : f32 to vector<8x256xf32>
      %c0_22 = arith.constant 0 : index
      %c0_23 = arith.constant 0 : index
      %35 = vector.load %arg8[%c0_22, %c0_23] : memref<8x256xf32, #tpu.memory_space<vmem>>, vector<8x256xf32>
      tpu.vector_store %arg8[%c0_22, %c0_23], %34 {strides = array<i32>} : memref<8x256xf32, #tpu.memory_space<vmem>>, vector<8x256xf32>,
    } else {
    }
    %c0 = arith.constant 0 : index
    %c0_1 = arith.constant 0 : index
    %3 = vector.load %arg2[%c0, %c0_1] : memref<8x256xf32, #tpu.memory_space<vmem>>, vector<8x256xf32>
    %c0_2 = arith.constant 0 : index
    %c0_3 = arith.constant 0 : index
    %4 = vector.load %arg3[%c0_2, %c0_3] : memref<8x256xf32, #tpu.memory_space<vmem>>, vector<8x256xf32>
    %c0_4 = arith.constant 0 : index
    %c0_5 = arith.constant 0 : index
    %5 = vector.load %arg4[%c0_4, %c0_5] : memref<8x1xf32, #tpu.memory_space<vmem>>, vector<8x1xf32>
    %6 = arith.subf %3, %4 : vector<8x256xf32>
    %7 = math.absf %6 : vector<8x256xf32>
    %8 = tpu.reciprocal %4 {approx = true} : vector<8x256xf32> -> vector<8x256xf32>
    %9 = arith.mulf %4, %8 : vector<8x256xf32>
    %cst = arith.constant 2.000000e+00 : f32
    %10 = vector.broadcast %cst : f32 to vector<8x256xf32>
    %11 = arith.subf %10, %9 : vector<8x256xf32>
    %12 = arith.mulf %8, %11 : vector<8x256xf32>
    %13 = arith.mulf %7, %12 : vector<8x256xf32>
    %c1_i32 = arith.constant 1 : i32
    %14 = tpu.dynamic_rotate %6 by %c1_i32 dim 0 : vector<8x256xf32>, i32 -> vector<8x256xf32>
    %15 = vector.broadcast %5 : vector<8x1xf32> to vector<8x256xf32>
    %16 = arith.mulf %14, %15 : vector<8x256xf32>
    %17 = arith.subf %6, %16 : vector<8x256xf32>
    %18 = math.absf %17 : vector<8x256xf32>
    %c0_6 = arith.constant 0 : index
    %c0_7 = arith.constant 0 : index
    %19 = vector.load %arg7[%c0_6, %c0_7] : memref<8x256xf32, #tpu.memory_space<vmem>>, vector<8x256xf32>
    %20 = vector.shape_cast %13 : vector<8x256xf32> to vector<1x8x256xf32>
    %cst_8 = arith.constant dense<0.000000e+00> : vector<8x256xf32>
    %21 = vector.multi_reduction <add>, %20, %cst_8 [0] : vector<1x8x256xf32> to vector<8x256xf32>
    %22 = arith.addf %19, %21 : vector<8x256xf32>
    %c0_9 = arith.constant 0 : index
    %c0_10 = arith.constant 0 : index
    %23 = vector.load %arg7[%c0_9, %c0_10] : memref<8x256xf32, #tpu.memory_space<vmem>>, vector<8x256xf32>
    tpu.vector_store %arg7[%c0_9, %c0_10], %22 {strides = array<i32>} : memref<8x256xf32, #tpu.memory_space<vmem>>, vector<8x256xf32>,
    %c0_11 = arith.constant 0 : index
    %c0_12 = arith.constant 0 : index
    %24 = vector.load %arg8[%c0_11, %c0_12] : memref<8x256xf32, #tpu.memory_space<vmem>>, vector<8x256xf32>
    %25 = vector.shape_cast %18 : vector<8x256xf32> to vector<1x8x256xf32>
    %cst_13 = arith.constant dense<0.000000e+00> : vector<8x256xf32>
    %26 = vector.multi_reduction <add>, %25, %cst_13 [0] : vector<1x8x256xf32> to vector<8x256xf32>
    %27 = arith.addf %24, %26 : vector<8x256xf32>
    %c0_14 = arith.constant 0 : index
    %c0_15 = arith.constant 0 : index
    %28 = vector.load %arg8[%c0_14, %c0_15] : memref<8x256xf32, #tpu.memory_space<vmem>>, vector<8x256xf32>
    tpu.vector_store %arg8[%c0_14, %c0_15], %27 {strides = array<i32>} : memref<8x256xf32, #tpu.memory_space<vmem>>, vector<8x256xf32>,
    %c0_i32_16 = arith.constant 0 : i32
    %29 = arith.cmpi eq, %arg1, %c0_i32_16 : i32
    %30 = arith.extui %29 : i1 to i32
    %c0_i32_17 = arith.constant 0 : i32
    %31 = arith.cmpi ne, %30, %c0_i32_17 : i32
    scf.if %31 {
      %c0_18 = arith.constant 0 : index
      %c0_19 = arith.constant 0 : index
      %32 = vector.load %arg7[%c0_18, %c0_19] : memref<8x256xf32, #tpu.memory_space<vmem>>, vector<8x256xf32>
      %33 = vector.shape_cast %32 : vector<8x256xf32> to vector<1x8x256xf32>
      %cst_20 = arith.constant dense<0.000000e+00> : vector<1xf32>
      %34 = vector.multi_reduction <add>, %33, %cst_20 [1, 2] : vector<1x8x256xf32> to vector<1xf32>
      %35 = vector.shape_cast %34 : vector<1xf32> to vector<1x1x1xf32>
      %36 = vector.extract %35[0, 0, 0] : f32 from vector<1x1x1xf32>
      %c0_21 = arith.constant 0 : index
      %c0_22 = arith.constant 0 : index
      %37 = memref.load %arg5[%c0_21, %c0_22] : memref<1x1xf32, #tpu.memory_space<smem>>
      memref.store %36, %arg5[%c0_21, %c0_22] : memref<1x1xf32, #tpu.memory_space<smem>>
      %c0_23 = arith.constant 0 : index
      %c0_24 = arith.constant 0 : index
      %38 = vector.load %arg8[%c0_23, %c0_24] : memref<8x256xf32, #tpu.memory_space<vmem>>, vector<8x256xf32>
      %39 = vector.shape_cast %38 : vector<8x256xf32> to vector<1x8x256xf32>
      %cst_25 = arith.constant dense<0.000000e+00> : vector<1xf32>
      %40 = vector.multi_reduction <add>, %39, %cst_25 [1, 2] : vector<1x8x256xf32> to vector<1xf32>
      %41 = vector.shape_cast %40 : vector<1xf32> to vector<1x1x1xf32>
      %42 = vector.extract %41[0, 0, 0] : f32 from vector<1x1x1xf32>
      %c0_26 = arith.constant 0 : index
      %c0_27 = arith.constant 0 : index
      %43 = memref.load %arg6[%c0_26, %c0_27] : memref<1x1xf32, #tpu.memory_space<smem>>
      memref.store %42, %arg6[%c0_26, %c0_27] : memref<1x1xf32, #tpu.memory_space<smem>>
    } else {
    }
    return
  }
  func.func @transform_0(%arg0: i32, %arg1: i32) -> (i32, i32) {
    %c0_i32 = arith.constant 0 : i32
    return %arg0, %arg1 : i32, i32
  }
  func.func @transform_1(%arg0: i32, %arg1: i32) -> (i32, i32) {
    %c0_i32 = arith.constant 0 : i32
    return %arg0, %arg1 : i32, i32
  }
  func.func @transform_2(%arg0: i32, %arg1: i32) -> (i32, i32) {
    %c0_i32 = arith.constant 0 : i32
    %c0_i32_0 = arith.constant 0 : i32
    return %arg0, %c0_i32 : i32, i32
  }
  func.func @transform_3(%arg0: i32, %arg1: i32) -> (i32, i32) {
    %c0_i32 = arith.constant 0 : i32
    %c0_i32_0 = arith.constant 0 : i32
    return %arg0, %c0_i32 : i32, i32
  }
  func.func @transform_4(%arg0: i32, %arg1: i32) -> (i32, i32) {
    %c0_i32 = arith.constant 0 : i32
    %c0_i32_0 = arith.constant 0 : i32
    return %arg0, %c0_i32 : i32, i32
  }
}

</mosaic_0001>

<bundles_post_ra>
// kernel: tpu_custom_call.1
= control target key start
LH: loop header
LB: loop body
LE: loop exit
PB: predicated region body
PF: predicated region fallthrough
CT: control target
= control target key end

     0   :  { %10 = vsyncpa [#allocation5], 0  ;;  %s323_s0 = inlined_call_operand.hbm [shape: f32[8,256], index: 0, kind: input, shape index: {}]   ;;  %s324_s1 = inlined_call_operand.hbm [shape: f32[8,256], index: 1, kind: input, shape index: {}]   ;;  %s325_s2 = inlined_call_operand.vmem [shape: f32[8,1], index: 2, kind: input, shape index: {}]   ;;  %s326_s3 = inlined_call_operand.hbm [shape: f32[1,1], index: 3, kind: output, shape index: {0}]   ;;  %s327_s4 = inlined_call_operand.hbm [shape: f32[1,1], index: 4, kind: output, shape index: {1}]  }
   0x1   :  { %11 = vsyncpa [#allocation8], 0 }
   0x2   :  { %12 = vsyncpa [#allocation6], 0 }
   0x3   :  { %13 = vsyncpa [#allocation11], 0  ;;  %s242_s15 = smov [#allocation4]   ;;  %s243_s17 = smov [#allocation7]  }
   0x4   :  { %s20_s16 = sshll.u32 %s242_s15, 4  ;;  %s30_s18 = sshll.u32 %s243_s17, 4  ;;  %s21_s16 = int_to_ptr.vmem [resolvable:$true] %s20_s16  ;;  %s31_s18 = int_to_ptr.vmem [resolvable:$true] %s30_s18 }
   0x5   :  { %s170_s21 = scalar_lea.hbm %s323_s0, 256 }
   0x6   :  { %p171_p0 = scmp.ne.s32.totalorder %s323_s0, %s170_s21  ;;  %p174_p1 = scmp.lt.u32.totalorder %s170_s21, %s323_s0 }
   0x8   :  { %p176_p2 = pnand %p174_p1, %p171_p0 }
   0xa   :  { %179 = shalt.err (!%p176_p2)
}
   0xb   :  { %s180_s26 = scalar_lea.vmem %s21_s16, 256  ;;  %p185_p4 = scmp.lt.s32.totalorder %s21_s16, %s21_s16 }
   0xc   :  { %p181_p3 = scmp.ne.s32.totalorder %s21_s16, %s180_s26  ;;  %p186_p5 = scmp.lt.s32.totalorder %s180_s26, %s180_s26 }
   0xe   :  { %p187_p6 = por %p186_p5, %p185_p4 }
  0x10   :  { %p188_p7 = pnand %p187_p6, %p181_p3 }
  0x12   :  { %191 = shalt.err (!%p188_p7)
}
  0x13   :  { %23 = dma.hbm_to_vmem [thread:$0]  %s323_s0, 256, %s21_s16, [#allocation5]  }
  0x14   :  { %s192_s5 = scalar_lea.hbm %s324_s1, 256 }
  0x15   :  { %p193_p8 = scmp.ne.s32.totalorder %s324_s1, %s192_s5  ;;  %p196_p9 = scmp.lt.u32.totalorder %s192_s5, %s324_s1 }
  0x17   :  { %p198_p10 = pnand %p196_p9, %p193_p8 }
  0x19   :  { %201 = shalt.err (!%p198_p10)
}
  0x1a   :  { %s202_s10 = scalar_lea.vmem %s31_s18, 256  ;;  %p207_p12 = scmp.lt.s32.totalorder %s31_s18, %s31_s18 }
  0x1b   :  { %p203_p11 = scmp.ne.s32.totalorder %s31_s18, %s202_s10  ;;  %p208_p13 = scmp.lt.s32.totalorder %s202_s10, %s202_s10 }
  0x1d   :  { %p209_p0 = por %p208_p13, %p207_p12 }
  0x1f   :  { %p210_p1 = pnand %p209_p0, %p203_p11 }
  0x21   :  { %213 = shalt.err (!%p210_p1)
}
  0x22   :  { %33 = dma.hbm_to_vmem [thread:$0]  %s324_s1, 256, %s31_s18, [#allocation8]  }
  0x23   :  { %234 = dma.done.wait [#allocation5], 256  }
  0x24   :  { %235 = vsyncadd [#allocation5], 4294967040 }
  0x25   :  { %236 = dma.done.wait [#allocation8], 256  }
  0x26   :  { %237 = vsyncadd [#allocation8], 4294967040  ;;  %v244_v0 = vmov 0   ;;  %v54_v1 = vld [vmem:[%s325_s2] sm:$0xff]  ;;  %v52_v2 = vld [vmem:[#allocation7] sm:$0xff]  ;;  %s214_s15 = scalar_lea.hbm %s326_s3, 16 }
  0x27   :  { %165 = vset.pattern.permute.xlu0 %v244_v0  ;;  %v53_v3 = vld [vmem:[#allocation7 + $0x8] sm:$0xff]  ;;  %166 = vrcp.f32 %v52_v2  ;;  %v50_v6 = vld [vmem:[#allocation4] sm:$0xff]  ;;  %v51_v7 = vld [vmem:[#allocation4 + $0x8] sm:$0xff]  ;;  %p215_p2 = scmp.ne.s32.totalorder %s326_s3, %s214_s15  ;;  %p218_p3 = scmp.lt.u32.totalorder %s214_s15, %s326_s3 }
  0x28   :  { %73 = vperm.xlu0 %165, %v54_v1   ;;  %168 = vrcp.f32 %v53_v3  ;;  %v55_v10 = vsub.f32 %v50_v6, %v52_v2  ;;  %v56_v11 = vsub.f32 %v51_v7, %v53_v3 }
  0x29   :  { %p220_p4 = pnand %p218_p3, %p215_p2 }
  0x2a   :  { %v57_v14 = vand.u32 2147483647, %v55_v10  ;;  %v58_v15 = vand.u32 2147483647, %v56_v11  ;;  %v69_v21 = vrot.slane %v55_v10, 7  ;;  %v70_v22 = vrot.slane %v56_v11, 7 }
  0x31   :  { %v167_v4 = vpop.eup %166 }
  0x32   :  { %v169_v5 = vpop.eup %168  ;;  %v61_v8 = vmul.f32 %v167_v4, %v52_v2 }
  0x33   :  { %v62_v9 = vmul.f32 %v169_v5, %v53_v3 }
  0x34   :  { %v63_v12 = vsub.f32 2.0, %v61_v8 }
  0x35   :  { %v64_v13 = vsub.f32 2.0, %v62_v9 }
  0x36   :  { %v65_v16 = vmul.f32 %v167_v4, %v63_v12 }
  0x37   :  { %v66_v17 = vmul.f32 %v169_v5, %v64_v13 }
  0x38   :  { %v67_v18 = vmul.f32 %v65_v16, %v57_v14 }
  0x39   :  { %v68_v19 = vmul.f32 %v66_v17, %v58_v15 }
  0x3b   :  { %v103_v20 = vadd.f32 %v68_v19, %v67_v18 }
  0x47   :  { %104 = vadd.xlane.f32.xlu0 %v103_v20 }
  0xa7   :  { %v74_v23 = vpop.permute.xlu0 %73 }
  0xa8   :  { %v76_v24 = vmul.f32 %v74_v23, %v69_v21  ;;  %v77_v25 = vmul.f32 %v74_v23, %v70_v22 }
  0xaa   :  { %v78_v26 = vsub.f32 %v55_v10, %v76_v24  ;;  %v79_v27 = vsub.f32 %v56_v11, %v77_v25 }
  0xac   :  { %v80_v28 = vand.u32 2147483647, %v78_v26  ;;  %v81_v29 = vand.u32 2147483647, %v79_v27 }
  0xae   :  { %v117_v30 = vadd.f32 %v81_v29, %v80_v28 }
  0xb0   :  { %118 = vadd.xlane.f32.xlu1 %v117_v30 }
  0xd4   :  { %v105_v31 = vpop.xlane.xlu0 %104 }
  0xd5   :  { %v106_v32 = vrot.slane %v105_v31, 4 }
  0xd7   :  { %v107_v33 = vadd.f32 %v106_v32, %v105_v31 }
  0xd9   :  { %v108_v34 = vrot.slane %v107_v33, 2 }
  0xdb   :  { %v109_v35 = vadd.f32 %v108_v34, %v107_v33 }
  0xdd   :  { %v110_v36 = vrot.slane %v109_v35, 1 }
  0xdf   :  { %v111_v37 = vadd.f32 %v110_v36, %v109_v35 }
  0xe1   :  { %156 = vpush %v111_v37 }
 0x112   :  { %s157_s1 = spop %156 }
 0x113   :  { %114 = sst [smem:[#allocation9]] %s157_s1 }
 0x114   :  { %223 = shalt.err (!%p220_p4)
}
 0x115   :  { %s245_s20 = smov [#allocation9]   ;;  %s224_s26 = scalar_lea.hbm %s327_s4, 16 }
 0x116   :  { %136 = dma.smem_to_hbm %s245_s20, 16, %s326_s3, [#allocation6]  }
 0x117   :  { %p225_p5 = scmp.ne.s32.totalorder %s327_s4, %s224_s26  ;;  %p228_p6 = scmp.lt.u32.totalorder %s224_s26, %s327_s4 }
 0x119   :  { %p230_p7 = pnand %p228_p6, %p225_p5 }
 0x13d   :  { %v119_v38 = vpop.xlane.xlu1 %118 }
 0x13e   :  { %v120_v39 = vrot.slane %v119_v38, 4 }
 0x140   :  { %v121_v40 = vadd.f32 %v120_v39, %v119_v38 }
 0x142   :  { %v122_v41 = vrot.slane %v121_v40, 2 }
 0x144   :  { %v123_v42 = vadd.f32 %v122_v41, %v121_v40 }
 0x146   :  { %v124_v43 = vrot.slane %v123_v42, 1 }
 0x148   :  { %v125_v44 = vadd.f32 %v124_v43, %v123_v42 }
 0x14a   :  { %158 = vpush %v125_v44 }
 0x17b   :  { %s159_s23 = spop %158 }
 0x17c   :  { %128 = sst [smem:[#allocation10]] %s159_s23 }
 0x17d   :  { %233 = shalt.err (!%p230_p7)
}
 0x17e   :  { %s246_s30 = smov [#allocation10]  }
 0x17f   :  { %144 = dma.smem_to_hbm %s246_s30, 16, %s327_s4, [#allocation11]  }
 0x180   :  { %238 = dma.done.wait [#allocation6], 16  }
 0x181   :  { %239 = vsyncadd [#allocation6], 4294967280 }
 0x182   :  { %240 = dma.done.wait [#allocation11], 16  }
 0x183   :  { %241 = vsyncadd [#allocation11], 4294967280 }
 0x184   :  { %151 = sfence }
 0x185   :  { %152 = vsyncpa [#allocation5], 1 }
 0x186   :  { %153 = vsyncpa [#allocation8], 1 }
 0x187   :  { %154 = vsyncpa [#allocation6], 1 }
 0x188   :  { %155 = vsyncpa [#allocation11], 1 }

</bundles_post_ra>
